<compile_context>
chip_gen: v7x
topology: tpu7x:2x2x1
jax: 0.10.0
libtpu: 0.0.40
codegen_flags: <defaults>
</compile_context>

<pallas_src>
import numpy as np
import jax
import jax.numpy as jnp
from jax import lax
from jax.experimental import pallas as pl
from jax.experimental.pallas import tpu as pltpu


def _text_encoder_kernel(idx_ref, cnt_ref, h_ref, w_ref, b_ref, o_ref):
    """One grid step == Bb batch elements.

    idx_ref : (Bb, Ep, K)  int32   sub-word indices per entity (padded with 0)
    cnt_ref : (Bb, Ep, 1)  int32   #valid indices per entity (0 => padded slot)
    h_ref   : (Bb, Sp, Hp) float32 hidden states
    w_ref   : (Hp, Tp)     float32 fc weight (already transposed: x @ W + b)
    b_ref   : (1, Tp)      float32 fc bias
    o_ref   : (Bb, Ep, Tp) float32 logits
    """
    idx = idx_ref[...]                       # [Bb, Ep, K]
    cnt = cnt_ref[...]                       # [Bb, Ep, 1]
    h = h_ref[...]                           # [Bb, Sp, Hp]

    Bb, Ep, K = idx.shape
    Sp = h.shape[1]
    Hp = h.shape[2]
    Tp = o_ref.shape[-1]

    # Hoisted validity mask: invalid slots -> -1 (never matches a seq position).
    iota_k = lax.broadcasted_iota(jnp.int32, (Bb, Ep, K), 2)
    idx_m = jnp.where(iota_k < cnt, idx, -1)                  # [Bb, Ep, K]

    # Pooling matrix P[b, e, s] = #times s appears among valid indices of (b, e).
    # Accumulate in int32 (one bool->int add per k), cast to f32 once.
    iota_s = lax.broadcasted_iota(jnp.int32, (Bb, Ep, Sp), 2)  # [Bb, Ep, Sp]
    p_int = jnp.zeros((Bb, Ep, Sp), dtype=jnp.int32)
    for k in range(K):                                         # K static & small
        p_int = p_int + (iota_s == idx_m[:, :, k:k + 1]).astype(jnp.int32)
    p = p_int.astype(jnp.float32)

    # Pool with the integer-valued P (sum of selected rows), then scale by
    # 1/count afterwards -> matches torch.mean exactly; count 0 -> zero row.
    embs = jnp.einsum('bes,bsh->beh', p, h,
                      preferred_element_type=jnp.float32)      # [Bb, Ep, Hp]
    cnt_f = cnt.astype(jnp.float32)
    inv = jnp.where(cnt_f > 0.0, 1.0 / cnt_f, 0.0)             # [Bb, Ep, 1]
    embs = embs * inv

    # fc: Linear(emb_size, n_tags) on the flattened (Bb*Ep) rows -> one matmul
    # with a better-filled MXU M dimension.
    embs2 = embs.reshape(Bb * Ep, Hp)
    logits = jnp.dot(embs2, w_ref[...],
                     preferred_element_type=jnp.float32) + b_ref[...]
    o_ref[...] = logits.reshape(Bb, Ep, Tp)


def _round_up(x, m):
    return ((x + m - 1) // m) * m


def _choose_batch_block(B, Sp, Hp, Ep, K, Tp,
                        max_block=8, vmem_budget_bytes=12 * 1024 * 1024):
    """Pick #batch elems per grid step so double-buffered blocks fit a budget."""
    per_b = 4 * (Sp * Hp + Ep * K + Ep + Ep * Tp) * 2   # f32/i32, x2 buffers
    bb = max(1, vmem_budget_bytes // max(per_b, 1))
    return int(max(1, min(max_block, bb, B)))


def text_encoder_logits(hidden_states, entity_idx, entity_cnt, fc_w, fc_b,
                        *, batch_block=8):
    """hidden_states [B,S,H] f32, entity_idx [B,E,K] i32, entity_cnt [B,E,1] i32,
    fc_w [H,T] f32, fc_b [1,T] f32  ->  logits [B,E,T] f32."""
    B, S, H = hidden_states.shape
    _, E, K = entity_idx.shape
    T = fc_w.shape[1]

    # Lane/sublane-friendly padded sizes.
    Hp = _round_up(H, 128)           # lane-dense hidden dim
    Tp = _round_up(T, 128)           # lane-dense logits store
    Ep = _round_up(E, 8)             # sublane-aligned entity dim
    Sp = _round_up(S, 8)
    Bb = _choose_batch_block(B, Sp, Hp, Ep, K, Tp, max_block=batch_block)
    Bp = _round_up(B, Bb)

    # Zero-padding is mathematically inert: extra H columns of hidden_states
    # meet zero rows of fc_w; padded entities/batches have count 0 (bias-only
    # logits) and are sliced off; padded tag columns are sliced off.
    h = jnp.zeros((Bp, Sp, Hp), jnp.float32).at[:B, :S, :H].set(hidden_states)
    idx = jnp.zeros((Bp, Ep, K), jnp.int32).at[:B, :E, :].set(entity_idx)
    cnt = jnp.zeros((Bp, Ep, 1), jnp.int32).at[:B, :E, :].set(entity_cnt)
    w = jnp.zeros((Hp, Tp), jnp.float32).at[:H, :T].set(fc_w)
    b = jnp.zeros((1, Tp), jnp.float32).at[:, :T].set(fc_b)

    out = pl.pallas_call(
        _text_encoder_kernel,
        out_shape=jax.ShapeDtypeStruct((Bp, Ep, Tp), jnp.float32),
        grid=(Bp // Bb,),
        in_specs=[
            pl.BlockSpec((Bb, Ep, K), lambda i: (i, 0, 0)),
            pl.BlockSpec((Bb, Ep, 1), lambda i: (i, 0, 0)),
            pl.BlockSpec((Bb, Sp, Hp), lambda i: (i, 0, 0)),
            # Constant block index -> weights stay resident in VMEM across grid.
            pl.BlockSpec((Hp, Tp), lambda i: (0, 0)),
            pl.BlockSpec((1, Tp), lambda i: (0, 0)),
        ],
        out_specs=pl.BlockSpec((Bb, Ep, Tp), lambda i: (i, 0, 0)),
        compiler_params=pltpu.CompilerParams(
            dimension_semantics=("parallel",)),
    )(idx, cnt, h, w, b)

    return out[:B, :E, :T]


def _reference_numpy(hidden_states, entity_subw_indices_batch, fc_w, fc_b, emb_size):
    """Direct port of the PyTorch forward's Python loops (zero_emb padding + fc)."""
    hidden = np.asarray(hidden_states)
    embs_batch, seq_lengths = [], []
    for n, entity_lists in enumerate(entity_subw_indices_batch):
        embs_list = []
        for inds in entity_lists:
            embs = [hidden[n][i] for i in inds]
            embs_list.append(np.mean(np.stack(embs), axis=0))
        seq_lengths.append(len(embs_list))
        embs_batch.append(embs_list)
    max_seq_len = max(seq_lengths)
    zero_emb = np.zeros((emb_size,), dtype=np.float32)
    for i in range(len(embs_batch)):
        for _ in range(max_seq_len - len(embs_batch[i])):
            embs_batch[i].append(zero_emb)
    embs_tensor = np.stack([np.stack(e) for e in embs_batch])            # [B,E,H]
    return embs_tensor @ np.asarray(fc_w) + np.asarray(fc_b)             # [B,E,T]


if __name__ == "__main__":
    # Small deterministic configuration
    B, S, H, T = 2, 16, 32, 8        # batch, seq len, emb_size, n_tags
    VOCAB = 50

    key = jax.random.PRNGKey(0)
    k_ids, k_emb, k_w, k_b = jax.random.split(key, 4)

    # Synthetic inputs of the module's forward
    input_ids = jax.random.randint(k_ids, (B, S), 0, VOCAB, dtype=jnp.int32)
    attention_mask = jnp.ones((B, S), dtype=jnp.float32)

    # Deterministic stand-in for the pretrained BERT encoder (plain JAX glue).
    embed_table = jax.random.normal(k_emb, (VOCAB, H), dtype=jnp.float32) * 0.1
    hidden_states = jnp.tanh(embed_table[input_ids]) * attention_mask[..., None]  # [B,S,H]

    # fc = nn.Linear(emb_size, n_tags): y = x @ W + b  (W already stored as [H,T])
    fc_w = jax.random.normal(k_w, (H, T), dtype=jnp.float32) * 0.1
    fc_b = jax.random.normal(k_b, (1, T), dtype=jnp.float32) * 0.1

    # Ragged entity sub-word indices (as lists, like the PyTorch input).
    entity_subw_indices_batch = [
        [[1, 2], [4], [6, 7, 8]],     # 3 entities in batch element 0
        [[0], [3, 4]],                # 2 entities in batch element 1
    ]

    # Densify: indices [B,E,K] and counts [B,E,1]; padded entities get count 0
    # (which reproduces the zero_emb padding -> fc gives just the bias).
    E = max(len(e) for e in entity_subw_indices_batch)
    K = max(len(ix) for e in entity_subw_indices_batch for ix in e)
    idx_np = np.zeros((B, E, K), dtype=np.int32)
    cnt_np = np.zeros((B, E, 1), dtype=np.int32)
    for n, entity_lists in enumerate(entity_subw_indices_batch):
        for e, inds in enumerate(entity_lists):
            idx_np[n, e, :len(inds)] = inds
            cnt_np[n, e, 0] = len(inds)
    entity_idx = jnp.asarray(idx_np)
    entity_cnt = jnp.asarray(cnt_np)

    logits = text_encoder_logits(hidden_states, entity_idx, entity_cnt, fc_w, fc_b)
    logits = jax.block_until_ready(logits)

    ref = _reference_numpy(hidden_states, entity_subw_indices_batch, fc_w, fc_b, H)
    np.testing.assert_allclose(np.asarray(logits), ref, rtol=1e-5, atol=1e-5)

    print("KERNEL_OK")
</pallas_src>

<mosaic_0001>
module attributes {stable_mosaic.version = 11 : i64} {
  func.func @_text_encoder_kernel(%arg0: i32, %arg1: memref<2x8x3xi32, #tpu.memory_space<vmem>>, %arg2: memref<2x8x1xi32, #tpu.memory_space<vmem>>, %arg3: memref<2x16x128xf32, #tpu.memory_space<vmem>>, %arg4: memref<128x128xf32, #tpu.memory_space<vmem>>, %arg5: memref<1x128xf32, #tpu.memory_space<vmem>>, %arg6: memref<2x8x128xf32, #tpu.memory_space<vmem>>) attributes {dimension_semantics = [#tpu.dimension_semantics<parallel>], iteration_bounds = array<i64: 1>, scalar_prefetch = 0 : i64, scratch_operands = 0 : i64, tpu.core_type = #tpu.core_type<tc>, window_params = [{transform_indices = @transform_0, window_bounds = array<i64: 2, 8, 3>}, {transform_indices = @transform_1, window_bounds = array<i64: 2, 8, 1>}, {transform_indices = @transform_2, window_bounds = array<i64: 2, 16, 128>}, {pipeline_mode = #tpu.pipeline_mode<synchronous>, transform_indices = @transform_3, window_bounds = array<i64: 128, 128>}, {pipeline_mode = #tpu.pipeline_mode<synchronous>, transform_indices = @transform_4, window_bounds = array<i64: 1, 128>}, {transform_indices = @transform_5, window_bounds = array<i64: 2, 8, 128>}]} {
    %c0 = arith.constant 0 : index
    %c0_0 = arith.constant 0 : index
    %c0_1 = arith.constant 0 : index
    %0 = vector.load %arg1[%c0, %c0_0, %c0_1] : memref<2x8x3xi32, #tpu.memory_space<vmem>>, vector<2x8x3xi32>
    %c0_2 = arith.constant 0 : index
    %c0_3 = arith.constant 0 : index
    %c0_4 = arith.constant 0 : index
    %1 = vector.load %arg2[%c0_2, %c0_3, %c0_4] : memref<2x8x1xi32, #tpu.memory_space<vmem>>, vector<2x8x1xi32>
    %c0_5 = arith.constant 0 : index
    %c0_6 = arith.constant 0 : index
    %c0_7 = arith.constant 0 : index
    %2 = vector.load %arg3[%c0_5, %c0_6, %c0_7] : memref<2x16x128xf32, #tpu.memory_space<vmem>>, vector<2x16x128xf32>
    %3 = tpu.iota {dimensions = array<i32: 2>} : vector<2x8x3xi32>
    %4 = vector.broadcast %1 : vector<2x8x1xi32> to vector<2x8x3xi32>
    %5 = arith.cmpi slt, %3, %4 : vector<2x8x3xi32>
    %c-1_i32 = arith.constant -1 : i32
    %6 = vector.broadcast %c-1_i32 : i32 to vector<2x8x3xi32>
    %7 = arith.select %5, %0, %6 : vector<2x8x3xi1>, vector<2x8x3xi32>
    %8 = tpu.iota {dimensions = array<i32: 2>} : vector<2x8x16xi32>
    %c0_i32 = arith.constant 0 : i32
    %9 = vector.broadcast %c0_i32 : i32 to vector<2x8x16xi32>
    %10 = vector.extract_strided_slice %7 {offsets = [0, 0, 0], sizes = [2, 8, 1], strides = [1, 1, 1]} : vector<2x8x3xi32> to vector<2x8x1xi32>
    %11 = vector.broadcast %10 : vector<2x8x1xi32> to vector<2x8x16xi32>
    %12 = arith.cmpi eq, %8, %11 : vector<2x8x16xi32>
    %13 = arith.extui %12 : vector<2x8x16xi1> to vector<2x8x16xi32>
    %14 = arith.addi %9, %13 : vector<2x8x16xi32>
    %15 = vector.extract_strided_slice %7 {offsets = [0, 0, 1], sizes = [2, 8, 1], strides = [1, 1, 1]} : vector<2x8x3xi32> to vector<2x8x1xi32>
    %16 = vector.broadcast %15 : vector<2x8x1xi32> to vector<2x8x16xi32>
    %17 = arith.cmpi eq, %8, %16 : vector<2x8x16xi32>
    %18 = arith.extui %17 : vector<2x8x16xi1> to vector<2x8x16xi32>
    %19 = arith.addi %14, %18 : vector<2x8x16xi32>
    %20 = vector.extract_strided_slice %7 {offsets = [0, 0, 2], sizes = [2, 8, 1], strides = [1, 1, 1]} : vector<2x8x3xi32> to vector<2x8x1xi32>
    %21 = vector.broadcast %20 : vector<2x8x1xi32> to vector<2x8x16xi32>
    %22 = arith.cmpi eq, %8, %21 : vector<2x8x16xi32>
    %23 = arith.extui %22 : vector<2x8x16xi1> to vector<2x8x16xi32>
    %24 = arith.addi %19, %23 : vector<2x8x16xi32>
    %25 = arith.sitofp %24 : vector<2x8x16xi32> to vector<2x8x16xf32>
    "tpu.trace_start"() <{level = 10 : i32, message = "bes,bsh->beh"}> : () -> ()
    %cst = arith.constant dense<0.000000e+00> : vector<2x8x128xf32>
    %26 = tpu.matmul %25, %2, %cst {dimension_numbers = #tpu.dot_dimension_numbers<[2], [1], [1], [2], [0, 0, 0, 1, 1, 2], [0], [0]>} : vector<2x8x16xf32>, vector<2x16x128xf32>, vector<2x8x128xf32> -> vector<2x8x128xf32>
    "tpu.trace_stop"() : () -> ()
    %27 = arith.sitofp %1 : vector<2x8x1xi32> to vector<2x8x1xf32>
    %cst_8 = arith.constant 0.000000e+00 : f32
    %28 = vector.broadcast %cst_8 : f32 to vector<2x8x1xf32>
    %29 = arith.cmpf ogt, %27, %28 : vector<2x8x1xf32>
    %cst_9 = arith.constant 1.000000e+00 : f32
    %30 = vector.broadcast %cst_9 : f32 to vector<2x8x1xf32>
    %31 = arith.divf %30, %27 : vector<2x8x1xf32>
    %cst_10 = arith.constant 0.000000e+00 : f32
    %32 = vector.broadcast %cst_10 : f32 to vector<2x8x1xf32>
    %33 = arith.select %29, %31, %32 : vector<2x8x1xi1>, vector<2x8x1xf32>
    %34 = vector.broadcast %33 : vector<2x8x1xf32> to vector<2x8x128xf32>
    %35 = arith.mulf %26, %34 : vector<2x8x128xf32>
    %36 = vector.shape_cast %35 : vector<2x8x128xf32> to vector<16x128xf32>
    %c0_11 = arith.constant 0 : index
    %c0_12 = arith.constant 0 : index
    %37 = vector.load %arg4[%c0_11, %c0_12] : memref<128x128xf32, #tpu.memory_space<vmem>>, vector<128x128xf32>
    %cst_13 = arith.constant dense<0.000000e+00> : vector<16x128xf32>
    %38 = tpu.matmul %36, %37, %cst_13 {dimension_numbers = #tpu.dot_dimension_numbers<[1], [0], [0], [1], [0, 0, 1, 1], [], []>} : vector<16x128xf32>, vector<128x128xf32>, vector<16x128xf32> -> vector<16x128xf32>
    %c0_14 = arith.constant 0 : index
    %c0_15 = arith.constant 0 : index
    %39 = vector.load %arg5[%c0_14, %c0_15] : memref<1x128xf32, #tpu.memory_space<vmem>>, vector<1x128xf32>
    %40 = vector.broadcast %39 : vector<1x128xf32> to vector<16x128xf32>
    %41 = arith.addf %38, %40 : vector<16x128xf32>
    %42 = vector.shape_cast %41 : vector<16x128xf32> to vector<2x8x128xf32>
    %c0_16 = arith.constant 0 : index
    %c0_17 = arith.constant 0 : index
    %c0_18 = arith.constant 0 : index
    %43 = vector.load %arg6[%c0_16, %c0_17, %c0_18] : memref<2x8x128xf32, #tpu.memory_space<vmem>>, vector<2x8x128xf32>
    tpu.vector_store %arg6[%c0_16, %c0_17, %c0_18], %42 {strides = array<i32>} : memref<2x8x128xf32, #tpu.memory_space<vmem>>, vector<2x8x128xf32>,
    return
  }
  func.func @transform_0(%arg0: i32) -> (i32, i32, i32) {
    %c0_i32 = arith.constant 0 : i32
    %c0_i32_0 = arith.constant 0 : i32
    %c0_i32_1 = arith.constant 0 : i32
    return %arg0, %c0_i32, %c0_i32_0 : i32, i32, i32
  }
  func.func @transform_1(%arg0: i32) -> (i32, i32, i32) {
    %c0_i32 = arith.constant 0 : i32
    %c0_i32_0 = arith.constant 0 : i32
    %c0_i32_1 = arith.constant 0 : i32
    return %arg0, %c0_i32, %c0_i32_0 : i32, i32, i32
  }
  func.func @transform_2(%arg0: i32) -> (i32, i32, i32) {
    %c0_i32 = arith.constant 0 : i32
    %c0_i32_0 = arith.constant 0 : i32
    %c0_i32_1 = arith.constant 0 : i32
    return %arg0, %c0_i32, %c0_i32_0 : i32, i32, i32
  }
  func.func @transform_3(%arg0: i32) -> (i32, i32) {
    %c0_i32 = arith.constant 0 : i32
    %c0_i32_0 = arith.constant 0 : i32
    %c0_i32_1 = arith.constant 0 : i32
    return %c0_i32, %c0_i32_0 : i32, i32
  }
  func.func @transform_4(%arg0: i32) -> (i32, i32) {
    %c0_i32 = arith.constant 0 : i32
    %c0_i32_0 = arith.constant 0 : i32
    %c0_i32_1 = arith.constant 0 : i32
    return %c0_i32, %c0_i32_0 : i32, i32
  }
  func.func @transform_5(%arg0: i32) -> (i32, i32, i32) {
    %c0_i32 = arith.constant 0 : i32
    %c0_i32_0 = arith.constant 0 : i32
    %c0_i32_1 = arith.constant 0 : i32
    return %arg0, %c0_i32, %c0_i32_0 : i32, i32, i32
  }
}

</mosaic_0001>

<bundles_post_ra>
// kernel: tpu_custom_call.1
= control target key start
LH: loop header
LB: loop body
LE: loop exit
PB: predicated region body
PF: predicated region fallthrough
CT: control target
= control target key end

     0   :  { %10 = vsyncpa [#allocation3], 0  ;;  %s683_s0 = inlined_call_operand.vmem [shape: s32[2,8,3], index: 0, kind: input, shape index: {}]   ;;  %s684_s1 = inlined_call_operand.vmem [shape: s32[2,8,1], index: 1, kind: input, shape index: {}]   ;;  %s685_s2 = inlined_call_operand.vmem [shape: f32[2,16,128], index: 2, kind: input, shape index: {}]   ;;  %s686_s3 = inlined_call_operand.hbm [shape: f32[128,128], index: 3, kind: input, shape index: {}]   ;;  %s687_s4 = inlined_call_operand.vmem [shape: f32[1,128], index: 4, kind: input, shape index: {}]   ;;  %s688_s5 = inlined_call_operand.hbm [shape: f32[2,8,128], index: 5, kind: output, shape index: {}]  }
   0x1   :  { %11 = vsyncpa [#allocation4], 0  ;;  %s561_s18 = smov [#allocation2]   ;;  %s513_s22 = scalar_lea.hbm %s686_s3, 2048 }
   0x2   :  { %s23_s19 = sshll.u32 %s561_s18, 4  ;;  %p514_p0 = scmp.ne.s32.totalorder %s686_s3, %s513_s22  ;;  %s24_s19 = int_to_ptr.vmem [resolvable:$true] %s23_s19 }
   0x3   :  { %p517_p1 = scmp.lt.u32.totalorder %s513_s22, %s686_s3 }
   0x5   :  { %p519_p2 = pnand %p517_p1, %p514_p0 }
   0x7   :  { %522 = shalt.err (!%p519_p2)
}
   0x8   :  { %s523_s27 = scalar_lea.vmem %s24_s19, 2048  ;;  %p528_p4 = scmp.lt.s32.totalorder %s24_s19, %s24_s19 }
   0x9   :  { %p524_p3 = scmp.ne.s32.totalorder %s24_s19, %s523_s27  ;;  %p529_p5 = scmp.lt.s32.totalorder %s523_s27, %s523_s27 }
   0xb   :  { %p530_p6 = por %p529_p5, %p528_p4 }
   0xd   :  { %p531_p7 = pnand %p530_p6, %p524_p3 }
   0xf   :  { %534 = shalt.err (!%p531_p7)
}
  0x10   :  { %s562_s28 = smov 128   ;;  %s563_s29 = smov 8  }
  0x11   :  { %29 = dma.hbm_to_vmem [thread:$0]  %s686_s3, 2048, %s24_s19, [#allocation3], %s562_s28, %s562_s28, %s563_s29  }
  0x12   :  { %557 = dma.done.wait [#allocation3], 2048  }
  0x13   :  { %558 = vsyncadd [#allocation3], 4294965248  ;;  %v564_v0 = vmov 0   ;;  %v37_v1 = vld [vmem:[%s684_s1] sm:$0xff]  ;;  %v38_v2 = vld [vmem:[%s684_s1 + $0x8] sm:$0xff]  ;;  %v565_v3 = vmov 2   ;;  %v43_v4 = vlaneseq }
  0x14   :  { %501 = vset.pattern.permute.xlu0 %v564_v0  ;;  %502 = vset.pattern.permute.xlu1 %v564_v0  ;;  %v35_v6 = vld [vmem:[%s683_s0] sm:$0xff]  ;;  %v36_v9 = vld [vmem:[%s683_s0 + $0x8] sm:$0xff]  ;;  %v566_v12 = vmov 1   ;;  %v238_v13 = vcvt.s32.f32 %v37_v1  ;;  %v239_v14 = vcvt.s32.f32 %v38_v2  ;;  %v567_v18 = vmov 0.0|0.0   ;;  %v260_v22 = vld [vmem:[#allocation2] sm:$0xff]  ;;  %s570_s21 = smov [#allocation5]  }
  0x15   :  { %46 = vperm.xlu0 %501, %v37_v1   ;;  %v624_v5 = vand.u32 127, %v43_v4  ;;  %v39_v15 = vld [vmem:[%s685_s2] sm:$0xff]  ;;  %v40_v16 = vld [vmem:[%s685_s2 + $0x8] sm:$0xff]  ;;  %453 = vmatprep.subr.bf16.mxu1 %v567_v18  ;;  %vm568_vm2 = vmmov 0   ;;  %v569_v19 = vmov 0.0   ;;  %v261_v23 = vld [vmem:[#allocation2 + $0x8] sm:$0xff] }
  0x16   :  { %v454_v17 = vpack.c.bf16 %v40_v16, %v39_v15  ;;  %509 = vrcp.f32 %v238_v13  ;;  %408 = vmatprep.mubr.msk.f32.mxu1 %vm568_vm2, %v569_v19  ;;  %vm240_vm3 = vcmp.gt.f32.partialorder %v238_v13, 0.0  ;;  %vm241_vm4 = vcmp.gt.f32.partialorder %v239_v14, 0.0  ;;  %v262_v24 = vld [vmem:[#allocation2 + $0x10] sm:$0xff]  ;;  %v263_v28 = vld [vmem:[#allocation2 + $0x18] sm:$0xff]  ;;  %v264_v30 = vld [vmem:[#allocation2 + $0x20] sm:$0xff]  ;;  %s365_s22 = sshll.u32 %s570_s21, 4  ;;  %s366_s22 = int_to_ptr.vmem [resolvable:$true] %s365_s22 }
  0x17   :  { %511 = vrcp.f32 %v239_v14  ;;  %v459_v27 = vpack.c.bf16 %v261_v23, %v260_v22  ;;  %v463_v29 = vpack.c.bf16 %v263_v28, %v262_v24  ;;  %v265_v31 = vld [vmem:[#allocation2 + $0x28] sm:$0xff]  ;;  %v266_v33 = vld [vmem:[#allocation2 + $0x30] sm:$0xff]  ;;  %v267_v34 = vld [vmem:[#allocation2 + $0x38] sm:$0xff]  ;;  %vm91_vm8 = vcmask 130048   ;;  %s535_s23 = scalar_lea.vmem %s366_s22, 256  ;;  %p540_p9 = scmp.lt.s32.totalorder %s366_s22, %s366_s22 }
  0x18   :  { %455 = vmatpush3.bf16.msra.mxu1 %v454_v17  ;;  %v467_v32 = vpack.c.bf16 %v265_v31, %v264_v30  ;;  %v471_v35 = vpack.c.bf16 %v267_v34, %v266_v33  ;;  %v268_v36 = vld [vmem:[#allocation2 + $0x40] sm:$0xff]  ;;  %v269_v37 = vld [vmem:[#allocation2 + $0x48] sm:$0xff]  ;;  %v270_v60 = vld [vmem:[#allocation2 + $0x50] sm:$0xff]  ;;  %p536_p8 = scmp.ne.s32.totalorder %s366_s22, %s535_s23  ;;  %p541_p10 = scmp.lt.s32.totalorder %s535_s23, %s535_s23 }
  0x19   :  { %49 = vperm.xlu0 %501, %v38_v2   ;;  %456 = vmatprep.subr.bf16.mxu1 %v567_v18  ;;  %v475_v38 = vpack.c.bf16 %v269_v37, %v268_v36  ;;  %v41_v45 = vld [vmem:[%s685_s2 + $0x10] sm:$0xff]  ;;  %v42_v46 = vld [vmem:[%s685_s2 + $0x18] sm:$0xff]  ;;  %v271_v61 = vld [vmem:[#allocation2 + $0x58] sm:$0xff] }
  0x1a   :  { %460 = vmatprep.subr.bf16.mxu0 %v459_v27  ;;  %v457_v50 = vpack.c.bf16 %v42_v46, %v41_v45  ;;  %v479_v62 = vpack.c.bf16 %v271_v61, %v270_v60  ;;  %v272_v63 = vld [vmem:[#allocation2 + $0x60] sm:$0xff]  ;;  %v273_v1 = vld [vmem:[#allocation2 + $0x68] sm:$0xff]  ;;  %v275_v4 = vld [vmem:[#allocation2 + $0x78] sm:$0xff]  ;;  %p542_p11 = por %p541_p10, %p540_p9 }
  0x1b   :  { %462 = vmatpush3.bf16.msra.mxu0 %v459_v27  ;;  %v483_v2 = vpack.c.bf16 %v273_v1, %v272_v63  ;;  %v379_v13 = vld [vmem:[%s687_s4] ss:$0 sm:$0xff] }
  0x1c   :  { %464 = vmatprep.subr.bf16.mxu0 %v463_v29  ;;  %p543_p12 = pnand %p542_p11, %p536_p8 }
  0x1d   :  { %504 = vset.pattern.permute.xlu0 %v565_v3  ;;  %v274_v3 = vld [vmem:[#allocation2 + $0x70] sm:$0xff] }
  0x1f   :  { %466 = vmatpush3.bf16.msra.mxu0 %v463_v29 }
  0x20   :  { %v510_v20 = vpop.eup %509  ;;  %468 = vmatprep.subr.bf16.mxu0 %v467_v32 }
  0x21   :  { %v512_v21 = vpop.eup %511  ;;  %v246_v25 = vsel %vm240_vm3, %v510_v20, 0.0 }
  0x22   :  { %v247_v26 = vsel %vm241_vm4, %v512_v21, 0.0 }
  0x23   :  { %470 = vmatpush3.bf16.msra.mxu0 %v467_v32 }
  0x24   :  { %472 = vmatprep.subr.bf16.mxu0 %v471_v35 }
  0x27   :  { %474 = vmatpush3.bf16.msra.mxu0 %v471_v35 }
  0x28   :  { %476 = vmatprep.subr.bf16.mxu0 %v475_v38 }
  0x2b   :  { %478 = vmatpush3.bf16.msra.mxu0 %v475_v38 }
  0x2c   :  { %480 = vmatprep.subr.bf16.mxu0 %v479_v62 }
  0x2f   :  { %482 = vmatpush3.bf16.msra.mxu0 %v479_v62 }
  0x30   :  { %484 = vmatprep.subr.bf16.mxu0 %v483_v2 }
  0x33   :  { %486 = vmatpush3.bf16.msra.mxu0 %v483_v2 }
  0x94   :  { %v47_v7 = vpop.permute.xlu0 %46 }
  0x95   :  { %vm51_vm0 = vcmp.lt.s32.totalorder %v624_v5, %v47_v7 }
  0x96   :  { %v53_v8 = vsel %vm51_vm0, %v35_v6, 4294967295 }
  0x97   :  { %78 = vperm.xlu0 %504, %v53_v8   ;;  %56 = vperm.xlu1 %502, %v53_v8  }
  0x98   :  { %v50_v10 = vpop.permute.xlu0 %49 }
  0x99   :  { %vm52_vm1 = vcmp.lt.s32.totalorder %v624_v5, %v50_v10 }
  0x9a   :  { %v54_v11 = vsel %vm52_vm1, %v36_v9, 4294967295 }
  0x9b   :  { %81 = vperm.xlu0 %504, %v54_v11   ;;  %503 = vset.pattern.permute.xlu1 %v566_v12 }
  0x9c   :  { %66 = vperm.xlu1 %503, %v53_v8  }
  0x9f   :  { %508 = vset.pattern.permute.xlu0 %v564_v0 }
  0xa0   :  { %505 = vset.pattern.permute.xlu1 %v564_v0  ;;  %255 = vperm.xlu0 %508, %v247_v26  }
  0xa1   :  { %59 = vperm.xlu1 %505, %v54_v11  }
  0xa5   :  { %506 = vset.pattern.permute.xlu1 %v566_v12 }
  0xa6   :  { %69 = vperm.xlu1 %506, %v54_v11  }
  0xaa   :  { %507 = vset.pattern.permute.xlu1 %v564_v0 }
  0xab   :  { %250 = vperm.xlu1 %507, %v246_v25  }
 0x116   :  { %v57_v39 = vpop.permute.xlu1 %56  ;;  %v79_v40 = vpop.permute.xlu0 %78 }
 0x117   :  { %vm61_vm5 = vcmp.eq.s32.totalorder %v624_v5, %v57_v39  ;;  %vm83_vm6 = vcmp.eq.s32.totalorder %v624_v5, %v79_v40 }
 0x118   :  { %v63_v42 = vsel %vm61_vm5, 1, %v564_v0  ;;  %v85_v47 = vsel %vm83_vm6, 1, %v564_v0 }
 0x11a   :  { %v82_v52 = vpop.permute.xlu0 %81 }
 0x11b   :  { %v67_v41 = vpop.permute.xlu1 %66  ;;  %vm84_vm10 = vcmp.eq.s32.totalorder %v624_v5, %v82_v52 }
 0x11c   :  { %vm71_vm7 = vcmp.eq.s32.totalorder %v624_v5, %v67_v41  ;;  %v86_v57 = vsel %vm84_vm10, 1, %v564_v0 }
 0x11d   :  { %v73_v43 = vsel %vm71_vm7, 1, %v564_v0 }
 0x11e   :  { %v75_v44 = vadd.s32 %v73_v43, %v63_v42 }
 0x11f   :  { %v256_v9 = vpop.permute.xlu0 %255 }
 0x120   :  { %v87_v48 = vadd.s32 %v85_v47, %v75_v44  ;;  %v60_v49 = vpop.permute.xlu1 %59 }
 0x121   :  { %vm62_vm9 = vcmp.eq.s32.totalorder %v624_v5, %v60_v49 }
 0x122   :  { %v89_v51 = vcvt.s32.f32 %v87_v48  ;;  %v64_v54 = vsel %vm62_vm9, 1, %v564_v0 }
 0x124   :  { %409 = vmatmul.mubr.msk.f32.vlgmr.msra.gmra.mrb[0].mxu1 %vm91_vm8, %v89_v51 }
 0x125   :  { %v70_v53 = vpop.permute.xlu1 %69  ;;  %458 = vmatpush3.bf16.msra.mxu1 %v457_v50  ;;  %415 = vmatprep.mubr.msk.f32.mxu1 %vm568_vm2, %v569_v19 }
 0x126   :  { %vm72_vm11 = vcmp.eq.s32.totalorder %v624_v5, %v70_v53  ;;  %v487_v5 = vpack.c.bf16 %v275_v4, %v274_v3 }
 0x127   :  { %v74_v55 = vsel %vm72_vm11, 1, %v564_v0 }
 0x128   :  { %v76_v56 = vadd.s32 %v74_v55, %v64_v54  ;;  %488 = vmatprep.subr.bf16.mxu0 %v487_v5 }
 0x129   :  { %490 = vmatpush3.bf16.msra.mxu0 %v487_v5 }
 0x12a   :  { %v88_v58 = vadd.s32 %v86_v57, %v76_v56  ;;  %v251_v0 = vpop.permute.xlu1 %250 }
 0x12c   :  { %v90_v59 = vcvt.s32.f32 %v88_v58 }
 0x12e   :  { %416 = vmatmul.mubr.msk.f32.vlgmr.msra.gmra.mrb[2].mxu1 %vm91_vm8, %v90_v59 }
 0x1f7   :  { %v161_v6 = vpop.f32.mrb[0].mxu1 }
 0x1f8   :  { %v410_v7 = vpop.f32.mrb[1].mxu1  ;;  %v258_v8 = vmul.f32 %v251_v0, %v161_v6 }
 0x1fa   :  { %450 = vmatprep.mubr.f32.mxu0 %v258_v8 }
 0x201   :  { %v234_v10 = vpop.f32.mrb[2].mxu1 }
 0x202   :  { %v259_v11 = vmul.f32 %v256_v9, %v234_v10  ;;  %v417_v12 = vpop.f32.mrb[3].mxu1 }
 0x204   :  { %451 = vmatmul.mubr.f32.vlgmr.msra.gmra.mrb[0].mxu0 %v259_v11 }
 0x2d7   :  { %v452_v14 = vpop.f32.mrb[0].mxu0 }
 0x2d8   :  { %v355_v15 = vadd.f32 %v452_v14, %v379_v13  ;;  %v349_v16 = vpop.f32.mrb[1].mxu0 }
 0x2d9   :  { %v350_v17 = vadd.f32 %v379_v13, %v349_v16 }
 0x2da   :  { %359 = vst [vmem:[#allocation5 + $0x8] sm:$0xff] %v355_v15 }
 0x2db   :  { %358 = vst [vmem:[#allocation5] sm:$0xff] %v350_v17 }
 0x2dc   :  { %546 = shalt.err (!%p543_p12)
}
 0x2dd   :  { %s547_s4 = scalar_lea.hbm %s688_s5, 256 }
 0x2de   :  { %p548_p13 = scmp.ne.s32.totalorder %s688_s5, %s547_s4  ;;  %p551_p0 = scmp.lt.u32.totalorder %s547_s4, %s688_s5 }
 0x2e0   :  { %p553_p1 = pnand %p551_p0, %p548_p13 }
 0x2e2   :  { %556 = shalt.err (!%p553_p1)
}
 0x2e3   :  { %371 = dma.vmem_to_hbm [thread:$0]  %s366_s22, 256, %s688_s5, [#allocation4], %s562_s28, %s562_s28, %s563_s29  }
 0x2e4   :  { %559 = dma.done.wait [#allocation4], 256  }
 0x2e5   :  { %560 = vsyncadd [#allocation4], 4294967040 }
 0x2e6   :  { %375 = vsyncpa [#allocation3], 1 }
 0x2e7   :  { %376 = vsyncpa [#allocation4], 1 }

</bundles_post_ra>
